<compile_context>
chip_gen: v6e
topology: v6e:2x2x1
jax: 0.10.0
libtpu: 0.0.40
codegen_flags: <defaults>
</compile_context>

<pallas_src>
import jax
import jax.numpy as jnp
from jax.experimental import pallas as pl
from jax.experimental.pallas import tpu as pltpu

_EPS = 2.2204e-16        # same eps as the reference PyTorch loss utilities
_LANES = 128
_MXU_SUM_MAX_N = 8192    # ones operand costs ~N*512 B of VMEM; beyond this, use XLU sums
_VMEM_BUDGET = 8 * 1024 * 1024  # budget for double-buffered input blocks (fits v5e default)


def _pick_tb(batch, n, num_inputs, itemsize=4):
    """Batch-tile size TB such that (a) TB divides B, (b) TB == B or TB % 8 == 0
    (the (8,128) block rule), and (c) num_inputs * 2 double-buffered (TB, N)
    blocks stay within a conservative VMEM budget."""
    bytes_per_row = n * itemsize
    max_tb = max(1, _VMEM_BUDGET // (num_inputs * 2 * bytes_per_row))
    if batch <= max_tb:
        return batch                      # single-block or full-batch tile
    tb = (max_tb // 8) * 8
    while tb >= 8:
        if batch % tb == 0:
            return tb
        tb -= 8
    # TODO(synk): no multiple-of-8 divisor of B fits the budget; fall back to a
    # single whole-batch block instead of padding the batch axis.
    return batch


def _metrics_from_tile(x, gt, fix):
    """Per-image metrics for one (TB, N) tile.  x = exp(inputs), gt, fix f32.

    Returns (kl, cc, sim, nss), each (TB, 1).  fix may be None (NSS skipped)."""
    tb, n = x.shape

    if n <= _MXU_SUM_MAX_N:
        # Row-sum on the MXU: v @ ones -> every output lane holds the row sum.
        ones = jnp.ones((n, _LANES), jnp.float32)

        def rsum(v):
            return jnp.dot(v, ones, preferred_element_type=jnp.float32)[:, :1]
    else:
        def rsum(v):
            return jnp.sum(v, axis=1, keepdims=True)

    sum_x = rsum(x)
    sum_gt = rsum(gt)
    # Exact reciprocals on (TB,1) row scalars only (bit-parity with PyTorch).
    inv_sum_x = 1.0 / sum_x
    inv_sum_gt = 1.0 / sum_gt

    # ---------------- kldiv ----------------
    x_d = x * inv_sum_x
    gt_d = gt * inv_sum_gt
    kl_b = rsum(gt_d * jnp.log(_EPS + gt_d / (x_d + _EPS)))            # (TB,1)

    # ---------------- cc (Pearson correlation, simplified) -------------
    # a = xc/std_x, b = gc/std_g  =>  sum(a*b)/sqrt(sum(a^2)*sum(b^2))
    #                              == sum(xc*gc)/sqrt(sum(xc^2)*sum(gc^2))
    inv_n = 1.0 / n
    xc = x - sum_x * inv_n
    gc = gt - sum_gt * inv_n
    sum_xc2 = rsum(xc * xc)
    sum_gc2 = rsum(gc * gc)
    cc_b = rsum(xc * gc) / jnp.sqrt(sum_xc2 * sum_gc2)                 # (TB,1)

    # ---------------- similarity (simplified) ----------------
    # (x-min)/(max-min) followed by /sum cancels (max-min):
    #   xs = (x - min_x) / (sum_x - n*min_x)
    min_x = jnp.min(x, axis=1, keepdims=True)
    min_g = jnp.min(gt, axis=1, keepdims=True)
    xs = (x - min_x) * (1.0 / (sum_x - n * min_x))
    gs = (gt - min_g) * (1.0 / (sum_gt - n * min_g))
    sim_b = rsum(jnp.minimum(xs, gs))                                  # (TB,1)

    # ---------------- nss (only with a fixation map) ----------------
    if fix is None:
        nss_b = jnp.zeros_like(kl_b)
    else:
        std_x = jnp.sqrt(sum_xc2 * (1.0 / (n - 1)))   # unbiased, as torch.std
        z = xc * (1.0 / (std_x + _EPS))
        nss_b = rsum(z * fix) / rsum(fix)                              # (TB,1)

    return kl_b, cc_b, sim_b, nss_b


def _pack_lanes(kl_b, cc_b, sim_b, nss_b):
    """Pack (TB,1) metrics into one lane-dense (TB,128) tile: lanes 0..3."""
    tb = kl_b.shape[0]
    lane = jax.lax.broadcasted_iota(jnp.int32, (tb, _LANES), 1)
    return jnp.where(lane == 0, kl_b,
           jnp.where(lane == 1, cc_b,
           jnp.where(lane == 2, sim_b, nss_b)))


def _sal_kernel_nofix(x_ref, t_ref, out_ref):
    x = jnp.exp(x_ref[...].astype(jnp.float32))     # s_map = inputs.exp()
    gt = t_ref[...].astype(jnp.float32)
    out_ref[...] = _pack_lanes(*_metrics_from_tile(x, gt, None))


def _sal_kernel_fix(x_ref, t_ref, f_ref, out_ref):
    x = jnp.exp(x_ref[...].astype(jnp.float32))
    gt = t_ref[...].astype(jnp.float32)
    fix = f_ref[...].astype(jnp.float32)
    out_ref[...] = _pack_lanes(*_metrics_from_tile(x, gt, fix))


def sal_loss(inputs, targets, fixations=None):
    """Forward pass of SalLoss.

    inputs  : (B, H, W) log-saliency predictions (the module exponentiates them)
    targets : (B, H, W) ground-truth saliency maps
    fixations (optional): (B, H, W) binary fixation maps

    Returns (loss, metrics_dict):
        loss = kl - cc               (fixations is None)
        loss = kl - cc - 0.1 * nss   (with fixations)
    """
    B, H, W = inputs.shape
    N = H * W
    # Keep native dtypes (bf16 halves HBM traffic); upcast happens in-kernel.
    x2 = inputs.reshape(B, N)
    t2 = targets.reshape(B, N)

    has_fix = fixations is not None
    num_inputs = 3 if has_fix else 2
    TB = _pick_tb(B, N, num_inputs)
    grid = (B // TB,)

    in_spec = pl.BlockSpec((TB, N), lambda b: (b, 0))
    out_spec = pl.BlockSpec((TB, _LANES), lambda b: (b, 0))

    if has_fix:
        kernel = _sal_kernel_fix
        args = (x2, t2, fixations.reshape(B, N))
        in_specs = [in_spec, in_spec, in_spec]
    else:
        kernel = _sal_kernel_nofix
        args = (x2, t2)
        in_specs = [in_spec, in_spec]

    out = pl.pallas_call(
        kernel,
        out_shape=jax.ShapeDtypeStruct((B, _LANES), jnp.float32),
        grid=grid,
        in_specs=in_specs,
        out_specs=out_spec,
        compiler_params=pltpu.CompilerParams(
            dimension_semantics=("parallel",)),
    )(*args)

    # Tiny batch-mean glue (B scalars per metric) outside the kernel.
    kl = jnp.mean(out[:, 0])
    cc_v = jnp.mean(out[:, 1])
    sim = jnp.mean(out[:, 2])

    if has_fix:
        nss_v = jnp.mean(out[:, 3])
        loss = kl - cc_v - 0.1 * nss_v
        metrics = {'kl': kl, 'cc': cc_v, 'sim': sim, 'nss': nss_v, 'loss': loss}
    else:
        loss = kl - cc_v
        metrics = {'kl': kl, 'cc': cc_v, 'sim': sim, 'loss': loss}
    # TODO(synk): AverageMeter bookkeeping (.item() host-side logging) is
    # intentionally left out of the kernel; metrics dict is returned instead.
    return loss, metrics


if __name__ == "__main__":
    key = jax.random.PRNGKey(0)
    k1, k2, k3 = jax.random.split(key, 3)

    B, H, W = 2, 16, 16
    # inputs are log-saliency (the module exponentiates them)
    inputs = jax.nn.log_softmax(
        jax.random.normal(k1, (B, H * W), jnp.float32), axis=-1
    ).reshape(B, H, W)
    targets = jax.random.uniform(k2, (B, H, W), jnp.float32, minval=0.0, maxval=1.0)
    fixations = (jax.random.uniform(k3, (B, H, W), jnp.float32) > 0.9).astype(jnp.float32)

    # Path 1: fixations=None  -> loss = kl - cc   (NSS block never runs)
    loss1, m1 = sal_loss(inputs, targets)
    jax.block_until_ready(loss1)

    # Path 2: with fixations  -> loss = kl - cc - 0.1 * nss
    loss2, m2 = sal_loss(inputs, targets, fixations)
    jax.block_until_ready(loss2)

    print("KERNEL_OK")
</pallas_src>

<mosaic_0001>
module attributes {stable_mosaic.version = 11 : i64} {
  func.func @_sal_kernel_nofix(%arg0: i32, %arg1: memref<2x256xf32, #tpu.memory_space<vmem>>, %arg2: memref<2x256xf32, #tpu.memory_space<vmem>>, %arg3: memref<2x128xf32, #tpu.memory_space<vmem>>) attributes {dimension_semantics = [#tpu.dimension_semantics<parallel>], iteration_bounds = array<i64: 1>, scalar_prefetch = 0 : i64, scratch_operands = 0 : i64, tpu.core_type = #tpu.core_type<tc>, window_params = [{transform_indices = @transform_0, window_bounds = array<i64: 2, 256>}, {transform_indices = @transform_1, window_bounds = array<i64: 2, 256>}, {transform_indices = @transform_2, window_bounds = array<i64: 2, 128>}]} {
    %c0 = arith.constant 0 : index
    %c0_0 = arith.constant 0 : index
    %0 = vector.load %arg1[%c0, %c0_0] : memref<2x256xf32, #tpu.memory_space<vmem>>, vector<2x256xf32>
    %1 = math.exp %0 : vector<2x256xf32>
    %c0_1 = arith.constant 0 : index
    %c0_2 = arith.constant 0 : index
    %2 = vector.load %arg2[%c0_1, %c0_2] : memref<2x256xf32, #tpu.memory_space<vmem>>, vector<2x256xf32>
    %cst = arith.constant 1.000000e+00 : f32
    %3 = vector.broadcast %cst : f32 to vector<256x128xf32>
    %cst_3 = arith.constant dense<0.000000e+00> : vector<2x128xf32>
    %4 = tpu.matmul %1, %3, %cst_3 {dimension_numbers = #tpu.dot_dimension_numbers<[1], [0], [0], [1], [0, 0, 1, 1], [], []>} : vector<2x256xf32>, vector<256x128xf32>, vector<2x128xf32> -> vector<2x128xf32>
    %5 = vector.extract_strided_slice %4 {offsets = [0, 0], sizes = [2, 1], strides = [1, 1]} : vector<2x128xf32> to vector<2x1xf32>
    %cst_4 = arith.constant dense<0.000000e+00> : vector<2x128xf32>
    %6 = tpu.matmul %2, %3, %cst_4 {dimension_numbers = #tpu.dot_dimension_numbers<[1], [0], [0], [1], [0, 0, 1, 1], [], []>} : vector<2x256xf32>, vector<256x128xf32>, vector<2x128xf32> -> vector<2x128xf32>
    %7 = vector.extract_strided_slice %6 {offsets = [0, 0], sizes = [2, 1], strides = [1, 1]} : vector<2x128xf32> to vector<2x1xf32>
    %cst_5 = arith.constant 1.000000e+00 : f32
    %8 = vector.broadcast %cst_5 : f32 to vector<2x1xf32>
    %9 = arith.divf %8, %5 : vector<2x1xf32>
    %cst_6 = arith.constant 1.000000e+00 : f32
    %10 = vector.broadcast %cst_6 : f32 to vector<2x1xf32>
    %11 = arith.divf %10, %7 : vector<2x1xf32>
    %12 = vector.broadcast %9 : vector<2x1xf32> to vector<2x256xf32>
    %13 = arith.mulf %1, %12 : vector<2x256xf32>
    %14 = vector.broadcast %11 : vector<2x1xf32> to vector<2x256xf32>
    %15 = arith.mulf %2, %14 : vector<2x256xf32>
    %cst_7 = arith.constant 2.220400e-16 : f32
    %16 = vector.broadcast %cst_7 : f32 to vector<2x256xf32>
    %17 = arith.addf %13, %16 : vector<2x256xf32>
    %18 = arith.divf %15, %17 : vector<2x256xf32>
    %cst_8 = arith.constant 2.220400e-16 : f32
    %19 = vector.broadcast %cst_8 : f32 to vector<2x256xf32>
    %20 = arith.addf %19, %18 : vector<2x256xf32>
    %21 = math.log %20 : vector<2x256xf32>
    %22 = arith.mulf %15, %21 : vector<2x256xf32>
    %cst_9 = arith.constant dense<0.000000e+00> : vector<2x128xf32>
    %23 = tpu.matmul %22, %3, %cst_9 {dimension_numbers = #tpu.dot_dimension_numbers<[1], [0], [0], [1], [0, 0, 1, 1], [], []>} : vector<2x256xf32>, vector<256x128xf32>, vector<2x128xf32> -> vector<2x128xf32>
    %24 = vector.extract_strided_slice %23 {offsets = [0, 0], sizes = [2, 1], strides = [1, 1]} : vector<2x128xf32> to vector<2x1xf32>
    %cst_10 = arith.constant 3.906250e-03 : f32
    %25 = vector.broadcast %cst_10 : f32 to vector<2x1xf32>
    %26 = arith.mulf %5, %25 : vector<2x1xf32>
    %27 = vector.broadcast %26 : vector<2x1xf32> to vector<2x256xf32>
    %28 = arith.subf %1, %27 : vector<2x256xf32>
    %cst_11 = arith.constant 3.906250e-03 : f32
    %29 = vector.broadcast %cst_11 : f32 to vector<2x1xf32>
    %30 = arith.mulf %7, %29 : vector<2x1xf32>
    %31 = vector.broadcast %30 : vector<2x1xf32> to vector<2x256xf32>
    %32 = arith.subf %2, %31 : vector<2x256xf32>
    %33 = arith.mulf %28, %28 : vector<2x256xf32>
    %cst_12 = arith.constant dense<0.000000e+00> : vector<2x128xf32>
    %34 = tpu.matmul %33, %3, %cst_12 {dimension_numbers = #tpu.dot_dimension_numbers<[1], [0], [0], [1], [0, 0, 1, 1], [], []>} : vector<2x256xf32>, vector<256x128xf32>, vector<2x128xf32> -> vector<2x128xf32>
    %35 = vector.extract_strided_slice %34 {offsets = [0, 0], sizes = [2, 1], strides = [1, 1]} : vector<2x128xf32> to vector<2x1xf32>
    %36 = arith.mulf %32, %32 : vector<2x256xf32>
    %cst_13 = arith.constant dense<0.000000e+00> : vector<2x128xf32>
    %37 = tpu.matmul %36, %3, %cst_13 {dimension_numbers = #tpu.dot_dimension_numbers<[1], [0], [0], [1], [0, 0, 1, 1], [], []>} : vector<2x256xf32>, vector<256x128xf32>, vector<2x128xf32> -> vector<2x128xf32>
    %38 = vector.extract_strided_slice %37 {offsets = [0, 0], sizes = [2, 1], strides = [1, 1]} : vector<2x128xf32> to vector<2x1xf32>
    %39 = arith.mulf %28, %32 : vector<2x256xf32>
    %cst_14 = arith.constant dense<0.000000e+00> : vector<2x128xf32>
    %40 = tpu.matmul %39, %3, %cst_14 {dimension_numbers = #tpu.dot_dimension_numbers<[1], [0], [0], [1], [0, 0, 1, 1], [], []>} : vector<2x256xf32>, vector<256x128xf32>, vector<2x128xf32> -> vector<2x128xf32>
    %41 = vector.extract_strided_slice %40 {offsets = [0, 0], sizes = [2, 1], strides = [1, 1]} : vector<2x128xf32> to vector<2x1xf32>
    %42 = arith.mulf %35, %38 : vector<2x1xf32>
    %43 = math.sqrt %42 : vector<2x1xf32>
    %44 = arith.divf %41, %43 : vector<2x1xf32>
    %cst_15 = arith.constant dense<0x7F800000> : vector<2xf32>
    %45 = vector.multi_reduction <minimumf>, %1, %cst_15 [1] : vector<2x256xf32> to vector<2xf32>
    %46 = vector.shape_cast %45 : vector<2xf32> to vector<2x1xf32>
    %cst_16 = arith.constant dense<0x7F800000> : vector<2xf32>
    %47 = vector.multi_reduction <minimumf>, %2, %cst_16 [1] : vector<2x256xf32> to vector<2xf32>
    %48 = vector.shape_cast %47 : vector<2xf32> to vector<2x1xf32>
    %49 = vector.broadcast %46 : vector<2x1xf32> to vector<2x256xf32>
    %50 = arith.subf %1, %49 : vector<2x256xf32>
    %cst_17 = arith.constant 2.560000e+02 : f32
    %51 = vector.broadcast %cst_17 : f32 to vector<2x1xf32>
    %52 = arith.mulf %51, %46 : vector<2x1xf32>
    %53 = arith.subf %5, %52 : vector<2x1xf32>
    %cst_18 = arith.constant 1.000000e+00 : f32
    %54 = vector.broadcast %cst_18 : f32 to vector<2x1xf32>
    %55 = arith.divf %54, %53 : vector<2x1xf32>
    %56 = vector.broadcast %55 : vector<2x1xf32> to vector<2x256xf32>
    %57 = arith.mulf %50, %56 : vector<2x256xf32>
    %58 = vector.broadcast %48 : vector<2x1xf32> to vector<2x256xf32>
    %59 = arith.subf %2, %58 : vector<2x256xf32>
    %cst_19 = arith.constant 2.560000e+02 : f32
    %60 = vector.broadcast %cst_19 : f32 to vector<2x1xf32>
    %61 = arith.mulf %60, %48 : vector<2x1xf32>
    %62 = arith.subf %7, %61 : vector<2x1xf32>
    %cst_20 = arith.constant 1.000000e+00 : f32
    %63 = vector.broadcast %cst_20 : f32 to vector<2x1xf32>
    %64 = arith.divf %63, %62 : vector<2x1xf32>
    %65 = vector.broadcast %64 : vector<2x1xf32> to vector<2x256xf32>
    %66 = arith.mulf %59, %65 : vector<2x256xf32>
    %67 = arith.minimumf %57, %66 : vector<2x256xf32>
    %cst_21 = arith.constant dense<0.000000e+00> : vector<2x128xf32>
    %68 = tpu.matmul %67, %3, %cst_21 {dimension_numbers = #tpu.dot_dimension_numbers<[1], [0], [0], [1], [0, 0, 1, 1], [], []>} : vector<2x256xf32>, vector<256x128xf32>, vector<2x128xf32> -> vector<2x128xf32>
    %69 = vector.extract_strided_slice %68 {offsets = [0, 0], sizes = [2, 1], strides = [1, 1]} : vector<2x128xf32> to vector<2x1xf32>
    %cst_22 = arith.constant 0.000000e+00 : f32
    %70 = vector.broadcast %cst_22 : f32 to vector<2x1xf32>
    %71 = tpu.iota {dimensions = array<i32: 1>} : vector<2x128xi32>
    %c0_i32 = arith.constant 0 : i32
    %72 = vector.broadcast %c0_i32 : i32 to vector<2x128xi32>
    %73 = arith.cmpi eq, %71, %72 : vector<2x128xi32>
    %c1_i32 = arith.constant 1 : i32
    %74 = vector.broadcast %c1_i32 : i32 to vector<2x128xi32>
    %75 = arith.cmpi eq, %71, %74 : vector<2x128xi32>
    %c2_i32 = arith.constant 2 : i32
    %76 = vector.broadcast %c2_i32 : i32 to vector<2x128xi32>
    %77 = arith.cmpi eq, %71, %76 : vector<2x128xi32>
    %78 = vector.shape_cast %69 : vector<2x1xf32> to vector<2x1xf32>
    %79 = vector.broadcast %78 : vector<2x1xf32> to vector<2x128xf32>
    %80 = vector.shape_cast %70 : vector<2x1xf32> to vector<2x1xf32>
    %81 = vector.broadcast %80 : vector<2x1xf32> to vector<2x128xf32>
    %82 = arith.select %77, %79, %81 : vector<2x128xi1>, vector<2x128xf32>
    %83 = vector.shape_cast %44 : vector<2x1xf32> to vector<2x1xf32>
    %84 = vector.broadcast %83 : vector<2x1xf32> to vector<2x128xf32>
    %85 = arith.select %75, %84, %82 : vector<2x128xi1>, vector<2x128xf32>
    %86 = vector.shape_cast %24 : vector<2x1xf32> to vector<2x1xf32>
    %87 = vector.broadcast %86 : vector<2x1xf32> to vector<2x128xf32>
    %88 = arith.select %73, %87, %85 : vector<2x128xi1>, vector<2x128xf32>
    %c0_23 = arith.constant 0 : index
    %c0_24 = arith.constant 0 : index
    %89 = vector.load %arg3[%c0_23, %c0_24] : memref<2x128xf32, #tpu.memory_space<vmem>>, vector<2x128xf32>
    tpu.vector_store %arg3[%c0_23, %c0_24], %88 {strides = array<i32>} : memref<2x128xf32, #tpu.memory_space<vmem>>, vector<2x128xf32>,
    return
  }
  func.func @transform_0(%arg0: i32) -> (i32, i32) {
    %c0_i32 = arith.constant 0 : i32
    %c0_i32_0 = arith.constant 0 : i32
    return %arg0, %c0_i32 : i32, i32
  }
  func.func @transform_1(%arg0: i32) -> (i32, i32) {
    %c0_i32 = arith.constant 0 : i32
    %c0_i32_0 = arith.constant 0 : i32
    return %arg0, %c0_i32 : i32, i32
  }
  func.func @transform_2(%arg0: i32) -> (i32, i32) {
    %c0_i32 = arith.constant 0 : i32
    %c0_i32_0 = arith.constant 0 : i32
    return %arg0, %c0_i32 : i32, i32
  }
}

</mosaic_0001>

<bundles_post_ra>
// kernel: tpu_custom_call.1
= control target key start
LH: loop header
LB: loop body
LE: loop exit
PB: predicated region body
PF: predicated region fallthrough
CT: control target
= control target key end

     0   :  { %7 = vsyncpa [#allocation3], 0  ;;  %s1453_s0 = inlined_call_operand.hbm [shape: f32[2,256], index: 0, kind: input, shape index: {}]   ;;  %s1454_s1 = inlined_call_operand.hbm [shape: f32[2,256], index: 1, kind: input, shape index: {}]   ;;  %s1455_s2 = inlined_call_operand.hbm [shape: f32[2,128], index: 2, kind: output, shape index: {}]  }
   0x1   :  { %8 = vsyncpa [#allocation6], 0 }
   0x2   :  { %9 = vsyncpa [#allocation4], 0  ;;  %s1129_s9 = smov [#allocation2]   ;;  %s1130_s11 = smov [#allocation5]  }
   0x3   :  { %s16_s10 = sshll.u32 %s1129_s9, 4  ;;  %s26_s12 = sshll.u32 %s1130_s11, 4  ;;  %s17_s10 = int_to_ptr.vmem [resolvable:$true] %s16_s10  ;;  %s27_s12 = int_to_ptr.vmem [resolvable:$true] %s26_s12 }
   0x4   :  { %s1071_s13 = scalar_lea.vmem %s17_s10, 64  ;;  %p1076_p1 = scmp.lt.s32.totalorder %s17_s10, %s17_s10 }
   0x5   :  { %p1072_p0 = scmp.ne.s32.totalorder %s17_s10, %s1071_s13  ;;  %p1077_p2 = scmp.lt.s32.totalorder %s1071_s13, %s1071_s13 }
   0x7   :  { %p1078_p3 = por %p1077_p2, %p1076_p1 }
   0x9   :  { %p1079_p4 = pnand %p1078_p3, %p1072_p0 }
   0xb   :  { %1082 = shalt.err (!%p1079_p4)
}
   0xc   :  { %19 = dma.hbm_to_vmem [thread:$0]  %s1453_s0, 64, %s17_s10, [#allocation3]  }
   0xd   :  { %s1091_s16 = scalar_lea.vmem %s27_s12, 64  ;;  %p1096_p6 = scmp.lt.s32.totalorder %s27_s12, %s27_s12 }
   0xe   :  { %p1092_p5 = scmp.ne.s32.totalorder %s27_s12, %s1091_s16  ;;  %p1097_p7 = scmp.lt.s32.totalorder %s1091_s16, %s1091_s16 }
  0x10   :  { %p1098_p8 = por %p1097_p7, %p1096_p6 }
  0x12   :  { %p1099_p9 = pnand %p1098_p8, %p1092_p5 }
  0x14   :  { %1102 = shalt.err (!%p1099_p9)
}
  0x15   :  { %29 = dma.hbm_to_vmem [thread:$0]  %s1454_s1, 64, %s27_s12, [#allocation6]  }
  0x16   :  { %1123 = dma.done.wait [#allocation3], 64  }
  0x17   :  { %1124 = vsyncadd [#allocation3], 4294967232 }
  0x18   :  { %1125 = dma.done.wait [#allocation6], 64  }
  0x19   :  { %1126 = vsyncadd [#allocation6], 4294967232  ;;  %v1131_v0 = vmov 1.0   ;;  %v36_v1 = vld [vmem:[#allocation2] sm:$0xf]  ;;  %v44_v5 = vlaneseq  ;;  %vm604_vm0 = vcmask 1041408  }
  0x1a   :  { %791 = vmatprep.subr.mxu0 %v1131_v0  ;;  %826 = vmatprep.subr.mxu1 %v1131_v0  ;;  %v37_v2 = vmul.f32 1.442695, %v36_v1  ;;  %v1132_v3 = vmov 1983009808   ;;  %v1201_v9 = vld [vmem:[#allocation5] sm:$0xf] }
  0x1b   :  { %792 = vmatpush3.msra.mxu0 %v1131_v0  ;;  %827 = vmatpush3.msra.mxu1 %v1131_v0  ;;  %v42_v4 = vunpack.c.l.s4 %v1132_v3  ;;  %v1186_v7 = vshrl.u32 %v44_v5, 7  ;;  %v1133_v18 = vmov 0   ;;  %v1134_v32 = vmov 269488144   ;;  %s1135_s0 = smov [#allocation7]  }
  0x1c   :  { %793 = vmatprep.subr.mxu0 %v1131_v0  ;;  %828 = vmatprep.subr.mxu1 %v1131_v0  ;;  %1045 = vpow2.f32 %v37_v2  ;;  %v211_v33 = vunpack.c.l.s4 %v1134_v32  ;;  %s781_s1 = sshll.u32 %s1135_s0, 4  ;;  %s782_s1 = int_to_ptr.vmem [resolvable:$true] %s781_s1 }
  0x1d   :  { %794 = vmatpush3.msra.mxu0 %v1131_v0  ;;  %829 = vmatpush3.msra.mxu1 %v1131_v0  ;;  %v43_v6 = vunpack.c.0.s8 %v42_v4  ;;  %s1103_s19 = scalar_lea.vmem %s782_s1, 32  ;;  %p1108_p11 = scmp.lt.s32.totalorder %s782_s1, %s782_s1 }
  0x1e   :  { %795 = vmatprep.subr.mxu0 %v1131_v0  ;;  %830 = vmatprep.subr.mxu1 %v1131_v0  ;;  %v212_v34 = vunpack.c.0.s8 %v211_v33  ;;  %p1104_p10 = scmp.ne.s32.totalorder %s782_s1, %s1103_s19  ;;  %p1109_p12 = scmp.lt.s32.totalorder %s1103_s19, %s1103_s19 }
  0x1f   :  { %796 = vmatpush3.msra.mxu0 %v1131_v0  ;;  %831 = vmatpush3.msra.mxu1 %v1131_v0  ;;  %v1197_v8 = vsub.s32 %v43_v6, %v1186_v7 }
  0x20   :  { %797 = vmatprep.subr.mxu0 %v1131_v0  ;;  %832 = vmatprep.subr.mxu1 %v1131_v0  ;;  %v1324_v35 = vsub.s32 %v212_v34, %v1186_v7  ;;  %p1110_p13 = por %p1109_p12, %p1108_p11 }
  0x21   :  { %798 = vmatpush3.msra.mxu0 %v1131_v0  ;;  %833 = vmatpush3.msra.mxu1 %v1131_v0  ;;  %v128_v10 = vrot.slane %v1201_v9, %v1197_v8 }
  0x22   :  { %799 = vmatprep.subr.mxu0 %v1131_v0  ;;  %834 = vmatprep.subr.mxu1 %v1131_v0  ;;  %p1111_p0 = pnand %p1110_p13, %p1104_p10 }
  0x23   :  { %800 = vmatpush3.msra.mxu0 %v1131_v0  ;;  %835 = vmatpush3.msra.mxu1 %v1131_v0  ;;  %v129_v13 = vcombine.high %v128_v10, %v128_v10  ;;  %v610_v15 = vsel %vm604_vm0, %v128_v10, inf }
  0x24   :  { %801 = vmatprep.subr.mxu0 %v1131_v0  ;;  %836 = vmatprep.subr.mxu1 %v1131_v0 }
  0x25   :  { %802 = vmatpush3.msra.mxu0 %v1131_v0  ;;  %837 = vmatpush3.msra.mxu1 %v1131_v0  ;;  %v611_v16 = vsel %vm604_vm0, %v129_v13, inf }
  0x26   :  { %803 = vmatprep.subr.mxu0 %v1131_v0  ;;  %838 = vmatprep.subr.mxu1 %v1131_v0  ;;  %v612_v17 = vmin.f32 %v610_v15, %v611_v16 }
  0x27   :  { %804 = vmatpush3.msra.mxu0 %v1131_v0  ;;  %839 = vmatpush3.msra.mxu1 %v1131_v0 }
  0x28   :  { %805 = vmatprep.subr.mxu0 %v1131_v0  ;;  %840 = vmatprep.subr.mxu1 %v1131_v0 }
  0x29   :  { %806 = vmatpush3.msra.mxu0 %v1131_v0  ;;  %841 = vmatpush3.msra.mxu1 %v1131_v0  ;;  %v1211_v11 = vpop.eup %1045 }
  0x2a   :  { %807 = vmatprep.subr.mxu0 %v1131_v0  ;;  %842 = vmatprep.subr.mxu1 %v1131_v0  ;;  %v1219_v12 = vrot.slane %v1211_v11, %v1197_v8 }
  0x2b   :  { %808 = vmatpush3.msra.mxu0 %v1131_v0  ;;  %843 = vmatpush3.msra.mxu1 %v1131_v0 }
  0x2c   :  { %809 = vmatprep.subr.mxu0 %v1131_v0  ;;  %844 = vmatprep.subr.mxu1 %v1131_v0  ;;  %v1231_v14 = vcombine.high %v1219_v12, %v1219_v12  ;;  %v605_v29 = vsel %vm604_vm0, %v1219_v12, inf }
  0x2d   :  { %810 = vmatpush3.msra.mxu0 %v1131_v0  ;;  %845 = vmatpush3.msra.mxu1 %v1131_v0 }
  0x2e   :  { %811 = vmatprep.subr.mxu0 %v1131_v0  ;;  %846 = vmatprep.subr.mxu1 %v1131_v0  ;;  %v606_v30 = vsel %vm604_vm0, %v1231_v14, inf }
  0x2f   :  { %812 = vmatpush3.msra.mxu0 %v1131_v0  ;;  %847 = vmatpush3.msra.mxu1 %v1131_v0  ;;  %v607_v31 = vmin.f32 %v605_v29, %v606_v30 }
  0x30   :  { %813 = vmatprep.subr.mxu0 %v1131_v0  ;;  %848 = vmatprep.subr.mxu1 %v1131_v0 }
  0x31   :  { %814 = vmatpush3.msra.mxu0 %v1131_v0  ;;  %849 = vmatpush3.msra.mxu1 %v1131_v0 }
  0x32   :  { %815 = vmatprep.subr.mxu0 %v1131_v0  ;;  %850 = vmatprep.subr.mxu1 %v1131_v0 }
  0x33   :  { %816 = vmatpush3.msra.mxu0 %v1131_v0  ;;  %851 = vmatpush3.msra.mxu1 %v1131_v0 }
  0x34   :  { %817 = vmatprep.subr.mxu0 %v1131_v0  ;;  %852 = vmatprep.subr.mxu1 %v1131_v0 }
  0x35   :  { %818 = vmatpush3.msra.mxu0 %v1131_v0  ;;  %853 = vmatpush3.msra.mxu1 %v1131_v0 }
  0x36   :  { %819 = vmatprep.subr.mxu0 %v1131_v0  ;;  %854 = vmatprep.subr.mxu1 %v1131_v0 }
  0x37   :  { %820 = vmatpush3.msra.mxu0 %v1131_v0  ;;  %855 = vmatpush3.msra.mxu1 %v1131_v0 }
  0x38   :  { %821 = vmatprep.subr.mxu0 %v1131_v0  ;;  %856 = vmatprep.subr.mxu1 %v1131_v0 }
  0x39   :  { %822 = vmatpush3.msra.mxu0 %v1131_v0  ;;  %115 = vmatprep.mubr.f32.mxu0 %v1231_v14 }
  0x3a   :  { %857 = vmatpush3.msra.mxu1 %v1131_v0  ;;  %196 = vmatprep.mubr.f32.mxu1 %v129_v13 }
  0x3b   :  { %116 = vmatmul.mubr.f32.vlgmr.msra.gmra.mxu0 %v1219_v12  ;;  %197 = vmatmul.mubr.f32.vlgmr.msra.gmra.mxu1 %v128_v10 }
  0x3c   :  { %613 = vmin.xlane.f32.xlu1 %v612_v17  ;;  %896 = vmatprep.subr.mxu1 %v1131_v0 }
  0x3d   :  { %897 = vmatpush3.msra.mxu1 %v1131_v0  ;;  %861 = vmatprep.subr.mxu0 %v1131_v0 }
  0x3e   :  { %898 = vmatprep.subr.mxu1 %v1131_v0  ;;  %862 = vmatpush3.msra.mxu0 %v1131_v0 }
  0x3f   :  { %899 = vmatpush3.msra.mxu1 %v1131_v0  ;;  %863 = vmatprep.subr.mxu0 %v1131_v0 }
  0x40   :  { %900 = vmatprep.subr.mxu1 %v1131_v0  ;;  %864 = vmatpush3.msra.mxu0 %v1131_v0 }
  0x41   :  { %901 = vmatpush3.msra.mxu1 %v1131_v0  ;;  %865 = vmatprep.subr.mxu0 %v1131_v0 }
  0x42   :  { %902 = vmatprep.subr.mxu1 %v1131_v0  ;;  %866 = vmatpush3.msra.mxu0 %v1131_v0 }
  0x43   :  { %903 = vmatpush3.msra.mxu1 %v1131_v0  ;;  %867 = vmatprep.subr.mxu0 %v1131_v0 }
  0x44   :  { %904 = vmatprep.subr.mxu1 %v1131_v0  ;;  %868 = vmatpush3.msra.mxu0 %v1131_v0 }
  0x45   :  { %905 = vmatpush3.msra.mxu1 %v1131_v0  ;;  %869 = vmatprep.subr.mxu0 %v1131_v0 }
  0x46   :  { %906 = vmatprep.subr.mxu1 %v1131_v0  ;;  %870 = vmatpush3.msra.mxu0 %v1131_v0 }
  0x47   :  { %907 = vmatpush3.msra.mxu1 %v1131_v0  ;;  %871 = vmatprep.subr.mxu0 %v1131_v0 }
  0x48   :  { %908 = vmatprep.subr.mxu1 %v1131_v0  ;;  %872 = vmatpush3.msra.mxu0 %v1131_v0 }
  0x49   :  { %909 = vmatpush3.msra.mxu1 %v1131_v0  ;;  %873 = vmatprep.subr.mxu0 %v1131_v0 }
  0x4a   :  { %910 = vmatprep.subr.mxu1 %v1131_v0  ;;  %874 = vmatpush3.msra.mxu0 %v1131_v0 }
  0x4b   :  { %911 = vmatpush3.msra.mxu1 %v1131_v0  ;;  %875 = vmatprep.subr.mxu0 %v1131_v0 }
  0x4c   :  { %912 = vmatprep.subr.mxu1 %v1131_v0  ;;  %876 = vmatpush3.msra.mxu0 %v1131_v0 }
  0x4d   :  { %913 = vmatpush3.msra.mxu1 %v1131_v0  ;;  %877 = vmatprep.subr.mxu0 %v1131_v0 }
  0x4e   :  { %914 = vmatprep.subr.mxu1 %v1131_v0  ;;  %878 = vmatpush3.msra.mxu0 %v1131_v0 }
  0x4f   :  { %915 = vmatpush3.msra.mxu1 %v1131_v0  ;;  %879 = vmatprep.subr.mxu0 %v1131_v0 }
  0x50   :  { %916 = vmatprep.subr.mxu1 %v1131_v0  ;;  %880 = vmatpush3.msra.mxu0 %v1131_v0 }
  0x51   :  { %917 = vmatpush3.msra.mxu1 %v1131_v0  ;;  %881 = vmatprep.subr.mxu0 %v1131_v0 }
  0x52   :  { %918 = vmatprep.subr.mxu1 %v1131_v0  ;;  %882 = vmatpush3.msra.mxu0 %v1131_v0 }
  0x53   :  { %919 = vmatpush3.msra.mxu1 %v1131_v0  ;;  %883 = vmatprep.subr.mxu0 %v1131_v0 }
  0x54   :  { %920 = vmatprep.subr.mxu1 %v1131_v0  ;;  %884 = vmatpush3.msra.mxu0 %v1131_v0 }
  0x55   :  { %921 = vmatpush3.msra.mxu1 %v1131_v0  ;;  %885 = vmatprep.subr.mxu0 %v1131_v0 }
  0x56   :  { %922 = vmatprep.subr.mxu1 %v1131_v0  ;;  %886 = vmatpush3.msra.mxu0 %v1131_v0 }
  0x57   :  { %923 = vmatpush3.msra.mxu1 %v1131_v0  ;;  %887 = vmatprep.subr.mxu0 %v1131_v0 }
  0x58   :  { %924 = vmatprep.subr.mxu1 %v1131_v0  ;;  %888 = vmatpush3.msra.mxu0 %v1131_v0 }
  0x59   :  { %925 = vmatpush3.msra.mxu1 %v1131_v0  ;;  %889 = vmatprep.subr.mxu0 %v1131_v0 }
  0x5a   :  { %926 = vmatprep.subr.mxu1 %v1131_v0  ;;  %890 = vmatpush3.msra.mxu0 %v1131_v0 }
  0x5b   :  { %927 = vmatpush3.msra.mxu1 %v1131_v0  ;;  %891 = vmatprep.subr.mxu0 %v1131_v0 }
  0x5c   :  { %966 = vmatprep.subr.mxu1 %v1131_v0  ;;  %892 = vmatpush3.msra.mxu0 %v1131_v0 }
  0x5d   :  { %931 = vmatprep.subr.mxu0 %v1131_v0  ;;  %1044 = vset.pattern.permute.xlu1 %v1133_v18 }
  0x5e   :  { %1043 = vset.pattern.permute.xlu0 %v1133_v18 }
  0xc5   :  { %v1326_v36 = vpop.xlane.xlu1 %613 }
  0xc6   :  { %v652_v4 = vmul.f32 256.0, %v1326_v36  ;;  %v649_v16 = vrot.slane %v1326_v36, %v1324_v35 }
  0xfb   :  { %v823_v19 = vpop.f32.mrf.mxu0  ;;  %v858_v20 = vpop.f32.mrf.mxu1 }
  0xfd   :  { %v824_v21 = vpop.f32.mrf.mxu0  ;;  %v859_v22 = vpop.f32.mrf.mxu1 }
  0xfe   :  { %v1311_v23 = vadd.f32 %v824_v21, %v823_v19  ;;  %v1313_v24 = vadd.f32 %v859_v22, %v858_v20  ;;  %v651_v20 = vsub.f32 %v1201_v9, %v649_v16 }
 0x100   :  { %1047 = vrcp.f32 %v1311_v23  ;;  %v320_v27 = vmul.f32 0.00390625, %v1311_v23  ;;  %v334_v28 = vmul.f32 0.00390625, %v1313_v24  ;;  %v653_v12 = vsub.f32 %v1313_v24, %v652_v4 }
 0x101   :  { %1049 = vrcp.f32 %v1313_v24 }
 0x10d   :  { %v1048_v25 = vpop.eup %1047 }
 0x10e   :  { %v1050_v26 = vpop.eup %1049  ;;  %208 = vperm.xlu0 %1043, %v1048_v25  }
 0x10f   :  { %221 = vperm.xlu1 %1044, %v1050_v26  }
 0x113   :  { %323 = vperm.xlu1 %1044, %v320_v27  }
 0x117   :  { %337 = vperm.xlu1 %1044, %v334_v28  }
 0x12d   :  { %608 = vmin.xlane.f32.xlu0 %v607_v31 }
 0x189   :  { %v209_v37 = vpop.permute.xlu0 %208 }
 0x18a   :  { %v222_v38 = vpop.permute.xlu1 %221  ;;  %v216_v39 = vrot.slane %v209_v37, %v1324_v35 }
 0x18b   :  { %v229_v50 = vrot.slane %v222_v38, %v1324_v35 }
 0x18c   :  { %v218_v40 = vmul.f32 %v1211_v11, %v216_v39 }
 0x18d   :  { %v231_v54 = vmul.f32 %v229_v50, %v1201_v9 }
 0x18e   :  { %v232_v41 = vadd.f32 2.2204e-16, %v218_v40  ;;  %v324_v42 = vpop.permute.xlu1 %323 }
 0x18f   :  { %v331_v43 = vrot.slane %v324_v42, %v1324_v35 }
 0x190   :  { %1051 = vrcp.f32 %v232_v41 }
 0x191   :  { %v333_v44 = vsub.f32 %v1211_v11, %v331_v43 }
 0x192   :  { %v338_v45 = vpop.permute.xlu1 %337 }
 0x193   :  { %v348_v46 = vmul.f32 %v333_v44, %v333_v44  ;;  %v345_v47 = vrot.slane %v338_v45, %v1324_v35 }
 0x195   :  { %v347_v48 = vsub.f32 %v1201_v9, %v345_v47  ;;  %v356_v49 = vrot.slane %v348_v46, %v1197_v8  ;;  %v752_v47 = vand.u32 127, %v44_v5 }
 0x197   :  { %v512_v51 = vmul.f32 %v347_v48, %v333_v44  ;;  %v357_v52 = vcombine.high %v356_v49, %v356_v49  ;;  %v430_v60 = vmul.f32 %v347_v48, %v347_v48  ;;  %vm755_vm3 = vcmp.eq.s32.totalorder %v752_v47, 2 }
 0x198   :  { %vm754_vm4 = vcmp.eq.s32.totalorder %v752_v47, 1  ;;  %vm753_vm5 = vcmp.eq.s32.totalorder %v752_v47, 0 }
 0x199   :  { %424 = vmatprep.mubr.f32.mxu1 %v357_v52  ;;  %v520_v53 = vrot.slane %v512_v51, %v1197_v8  ;;  %v438_v63 = vrot.slane %v430_v60, %v1197_v8 }
 0x19a   :  { %425 = vmatmul.mubr.f32.vlgmr.msra.gmra.mxu1 %v356_v49 }
 0x19b   :  { %967 = vmatpush3.msra.mxu1 %v1131_v0  ;;  %v521_v55 = vcombine.high %v520_v53, %v520_v53  ;;  %v439_v7 = vcombine.high %v438_v63, %v438_v63 }
 0x19c   :  { %968 = vmatprep.subr.mxu1 %v1131_v0 }
 0x19d   :  { %v1052_v56 = vpop.eup %1051  ;;  %969 = vmatpush3.msra.mxu1 %v1131_v0  ;;  %588 = vmatprep.mubr.f32.mxu1 %v521_v55 }
 0x19e   :  { %970 = vmatprep.subr.mxu1 %v1131_v0  ;;  %v234_v57 = vmul.f32 %v1052_v56, %v231_v54 }
 0x19f   :  { %971 = vmatpush3.msra.mxu1 %v1131_v0 }
 0x1a0   :  { %972 = vmatprep.subr.mxu1 %v1131_v0  ;;  %v235_v58 = vadd.f32 2.2204e-16, %v234_v57 }
 0x1a1   :  { %973 = vmatpush3.msra.mxu1 %v1131_v0 }
 0x1a2   :  { %974 = vmatprep.subr.mxu1 %v1131_v0  ;;  %1053 = vlog2.f32 %v235_v58 }
 0x1a3   :  { %975 = vmatpush3.msra.mxu1 %v1131_v0 }
 0x1a4   :  { %976 = vmatprep.subr.mxu1 %v1131_v0 }
 0x1a5   :  { %977 = vmatpush3.msra.mxu1 %v1131_v0 }
 0x1a6   :  { %978 = vmatprep.subr.mxu1 %v1131_v0 }
 0x1a7   :  { %979 = vmatpush3.msra.mxu1 %v1131_v0 }
 0x1a8   :  { %980 = vmatprep.subr.mxu1 %v1131_v0 }
 0x1a9   :  { %981 = vmatpush3.msra.mxu1 %v1131_v0 }
 0x1aa   :  { %982 = vmatprep.subr.mxu1 %v1131_v0 }
 0x1ab   :  { %983 = vmatpush3.msra.mxu1 %v1131_v0 }
 0x1ac   :  { %984 = vmatprep.subr.mxu1 %v1131_v0 }
 0x1ad   :  { %985 = vmatpush3.msra.mxu1 %v1131_v0 }
 0x1ae   :  { %986 = vmatprep.subr.mxu1 %v1131_v0 }
 0x1af   :  { %v1054_v59 = vpop.eup %1053  ;;  %987 = vmatpush3.msra.mxu1 %v1131_v0 }
 0x1b0   :  { %988 = vmatprep.subr.mxu1 %v1131_v0  ;;  %v237_v61 = vmul.f32 0.6931472, %v1054_v59 }
 0x1b1   :  { %989 = vmatpush3.msra.mxu1 %v1131_v0 }
 0x1b2   :  { %990 = vmatprep.subr.mxu1 %v1131_v0  ;;  %v238_v62 = vmul.f32 %v237_v61, %v231_v54 }
 0x1b3   :  { %991 = vmatpush3.msra.mxu1 %v1131_v0 }
 0x1b4   :  { %992 = vmatprep.subr.mxu1 %v1131_v0  ;;  %v246_v1 = vrot.slane %v238_v62, %v1197_v8 }
 0x1b5   :  { %993 = vmatpush3.msra.mxu1 %v1131_v0 }
 0x1b6   :  { %994 = vmatprep.subr.mxu1 %v1131_v0  ;;  %v1368_v2 = vpop.xlane.xlu0 %608  ;;  %v247_v3 = vcombine.high %v246_v1, %v246_v1 }
 0x1b7   :  { %995 = vmatpush3.msra.mxu1 %v1131_v0  ;;  %v625_v6 = vmul.f32 256.0, %v1368_v2  ;;  %v622_v17 = vrot.slane %v1368_v2, %v1324_v35 }
 0x1b8   :  { %996 = vmatprep.subr.mxu1 %v1131_v0  ;;  %314 = vmatprep.mubr.f32.mxu0 %v247_v3 }
 0x1b9   :  { %v626_v10 = vsub.f32 %v1311_v23, %v625_v6  ;;  %997 = vmatpush3.msra.mxu1 %v1131_v0  ;;  %315 = vmatmul.mubr.f32.vlgmr.msra.gmra.mxu0 %v246_v1  ;;  %v624_v21 = vsub.f32 %v1211_v11, %v622_v17 }
 0x1ba   :  { %589 = vmatmul.mubr.f32.vlgmr.msra.gmra.mxu1 %v520_v53  ;;  %932 = vmatpush3.msra.mxu0 %v1131_v0 }
 0x1bb   :  { %1055 = vrcp.f32 %v626_v10  ;;  %933 = vmatprep.subr.mxu0 %v1131_v0  ;;  %506 = vmatprep.mubr.f32.mxu0 %v439_v7 }
 0x1bc   :  { %934 = vmatpush3.msra.mxu0 %v1131_v0  ;;  %1057 = vrcp.f32 %v653_v12 }
 0x1bd   :  { %935 = vmatprep.subr.mxu0 %v1131_v0 }
 0x1be   :  { %936 = vmatpush3.msra.mxu0 %v1131_v0 }
 0x1bf   :  { %937 = vmatprep.subr.mxu0 %v1131_v0 }
 0x1c0   :  { %938 = vmatpush3.msra.mxu0 %v1131_v0 }
 0x1c1   :  { %939 = vmatprep.subr.mxu0 %v1131_v0 }
 0x1c2   :  { %940 = vmatpush3.msra.mxu0 %v1131_v0 }
 0x1c3   :  { %941 = vmatprep.subr.mxu0 %v1131_v0 }
 0x1c4   :  { %942 = vmatpush3.msra.mxu0 %v1131_v0 }
 0x1c5   :  { %943 = vmatprep.subr.mxu0 %v1131_v0 }
 0x1c6   :  { %944 = vmatpush3.msra.mxu0 %v1131_v0 }
 0x1c7   :  { %945 = vmatprep.subr.mxu0 %v1131_v0 }
 0x1c8   :  { %v1056_v13 = vpop.eup %1055  ;;  %946 = vmatpush3.msra.mxu0 %v1131_v0 }
 0x1c9   :  { %947 = vmatprep.subr.mxu0 %v1131_v0  ;;  %631 = vperm.xlu1 %1044, %v1056_v13   ;;  %v1058_v14 = vpop.eup %1057 }
 0x1ca   :  { %948 = vmatpush3.msra.mxu0 %v1131_v0 }
 0x1cb   :  { %949 = vmatprep.subr.mxu0 %v1131_v0 }
 0x1cc   :  { %950 = vmatpush3.msra.mxu0 %v1131_v0 }
 0x1cd   :  { %951 = vmatprep.subr.mxu0 %v1131_v0  ;;  %658 = vperm.xlu1 %1044, %v1058_v14  }
 0x1ce   :  { %952 = vmatpush3.msra.mxu0 %v1131_v0 }
 0x1cf   :  { %953 = vmatprep.subr.mxu0 %v1131_v0 }
 0x1d0   :  { %954 = vmatpush3.msra.mxu0 %v1131_v0 }
 0x1d1   :  { %955 = vmatprep.subr.mxu0 %v1131_v0 }
 0x1d2   :  { %956 = vmatpush3.msra.mxu0 %v1131_v0 }
 0x1d3   :  { %957 = vmatprep.subr.mxu0 %v1131_v0 }
 0x1d4   :  { %958 = vmatpush3.msra.mxu0 %v1131_v0 }
 0x1d5   :  { %959 = vmatprep.subr.mxu0 %v1131_v0 }
 0x1d6   :  { %960 = vmatpush3.msra.mxu0 %v1131_v0 }
 0x1d7   :  { %961 = vmatprep.subr.mxu0 %v1131_v0 }
 0x1d8   :  { %962 = vmatpush3.msra.mxu0 %v1131_v0 }
 0x1d9   :  { %507 = vmatmul.mubr.f32.vlgmr.msra.gmra.mxu0 %v438_v63  ;;  %1001 = vmatprep.subr.mxu0 %v1131_v0 }
 0x1da   :  { %1002 = vmatpush3.msra.mxu0 %v1131_v0 }
 0x1db   :  { %1003 = vmatprep.subr.mxu0 %v1131_v0 }
 0x1dc   :  { %1004 = vmatpush3.msra.mxu0 %v1131_v0 }
 0x1dd   :  { %1005 = vmatprep.subr.mxu0 %v1131_v0 }
 0x1de   :  { %1006 = vmatpush3.msra.mxu0 %v1131_v0 }
 0x1df   :  { %1007 = vmatprep.subr.mxu0 %v1131_v0 }
 0x1e0   :  { %1008 = vmatpush3.msra.mxu0 %v1131_v0 }
 0x1e1   :  { %1009 = vmatprep.subr.mxu0 %v1131_v0 }
 0x1e2   :  { %1010 = vmatpush3.msra.mxu0 %v1131_v0 }
 0x1e3   :  { %1011 = vmatprep.subr.mxu0 %v1131_v0 }
 0x1e4   :  { %1012 = vmatpush3.msra.mxu0 %v1131_v0 }
 0x1e5   :  { %1013 = vmatprep.subr.mxu0 %v1131_v0 }
 0x1e6   :  { %1014 = vmatpush3.msra.mxu0 %v1131_v0 }
 0x1e7   :  { %1015 = vmatprep.subr.mxu0 %v1131_v0 }
 0x1e8   :  { %1016 = vmatpush3.msra.mxu0 %v1131_v0 }
 0x1e9   :  { %1017 = vmatprep.subr.mxu0 %v1131_v0 }
 0x1ea   :  { %1018 = vmatpush3.msra.mxu0 %v1131_v0 }
 0x1eb   :  { %1019 = vmatprep.subr.mxu0 %v1131_v0 }
 0x1ec   :  { %1020 = vmatpush3.msra.mxu0 %v1131_v0 }
 0x1ed   :  { %1021 = vmatprep.subr.mxu0 %v1131_v0 }
 0x1ee   :  { %1022 = vmatpush3.msra.mxu0 %v1131_v0 }
 0x1ef   :  { %1023 = vmatprep.subr.mxu0 %v1131_v0 }
 0x1f0   :  { %1024 = vmatpush3.msra.mxu0 %v1131_v0 }
 0x1f1   :  { %1025 = vmatprep.subr.mxu0 %v1131_v0 }
 0x1f2   :  { %1026 = vmatpush3.msra.mxu0 %v1131_v0 }
 0x1f3   :  { %1027 = vmatprep.subr.mxu0 %v1131_v0 }
 0x1f4   :  { %1028 = vmatpush3.msra.mxu0 %v1131_v0 }
 0x1f5   :  { %1029 = vmatprep.subr.mxu0 %v1131_v0 }
 0x1f6   :  { %1030 = vmatpush3.msra.mxu0 %v1131_v0 }
 0x1f7   :  { %1031 = vmatprep.subr.mxu0 %v1131_v0 }
 0x1f8   :  { %1032 = vmatpush3.msra.mxu0 %v1131_v0 }
 0x244   :  { %v632_v15 = vpop.permute.xlu1 %631 }
 0x245   :  { %v639_v18 = vrot.slane %v632_v15, %v1324_v35 }
 0x247   :  { %v641_v23 = vmul.f32 %v639_v18, %v624_v21 }
 0x248   :  { %v659_v19 = vpop.permute.xlu1 %658 }
 0x249   :  { %v666_v22 = vrot.slane %v659_v19, %v1324_v35 }
 0x24b   :  { %v668_v24 = vmul.f32 %v666_v22, %v651_v20 }
 0x24d   :  { %v669_v25 = vmin.f32 %v641_v23, %v668_v24 }
 0x24f   :  { %v677_v0 = vrot.slane %v669_v25, %v1197_v8 }
 0x251   :  { %v678_v26 = vcombine.high %v677_v0, %v677_v0 }
 0x253   :  { %745 = vmatprep.mubr.f32.mxu0 %v678_v26 }
 0x254   :  { %746 = vmatmul.mubr.f32.vlgmr.msra.gmra.mxu0 %v677_v0 }
 0x25a   :  { %v928_v28 = vpop.f32.mrf.mxu1 }
 0x25c   :  { %v929_v30 = vpop.f32.mrf.mxu1 }
 0x25d   :  { %v930_v33 = vadd.f32 %v929_v30, %v928_v28 }
 0x279   :  { %v893_v27 = vpop.f32.mrf.mxu0 }
 0x27a   :  { %v998_v38 = vpop.f32.mrf.mxu1 }
 0x27b   :  { %v894_v29 = vpop.f32.mrf.mxu0 }
 0x27c   :  { %v999_v39 = vpop.f32.mrf.mxu1  ;;  %v895_v43 = vadd.f32 %v894_v29, %v893_v27 }
 0x27d   :  { %v1000_v40 = vadd.f32 %v999_v39, %v998_v38 }
 0x299   :  { %v963_v31 = vpop.f32.mrf.mxu0 }
 0x29b   :  { %v964_v32 = vpop.f32.mrf.mxu0 }
 0x29c   :  { %v965_v9 = vadd.f32 %v964_v32, %v963_v31 }
 0x29e   :  { %v594_v34 = vmul.f32 %v965_v9, %v930_v33 }
 0x2a0   :  { %1059 = vrsqrt.f32 %v594_v34  ;;  %vm597_vm1 = vcmp.eq.f32.partialorder %v594_v34, inf  ;;  %v600_v36 = vand.u32 2147483648, %v594_v34  ;;  %vm599_vm2 = vcmp.eq.f32.partialorder %v594_v34, 0.0 }
 0x2ad   :  { %v1060_v11 = vpop.eup %1059 }
 0x2ae   :  { %v596_v35 = vmul.f32 %v1060_v11, %v594_v34 }
 0x2b0   :  { %v598_v37 = vsel %vm597_vm1, %v594_v34, %v596_v35 }
 0x2b1   :  { %v601_v8 = vsel %vm599_vm2, %v600_v36, %v598_v37 }
 0x2b2   :  { %1061 = vrcp.f32 %v601_v8 }
 0x2bf   :  { %v1062_v41 = vpop.eup %1061 }
 0x2c0   :  { %v603_v42 = vmul.f32 %v1062_v41, %v1000_v40 }
 0x2c2   :  { %764 = vperm.xlu1 %1044, %v603_v42  }
 0x2c6   :  { %770 = vperm.xlu1 %1044, %v895_v43  }
 0x314   :  { %v1033_v44 = vpop.f32.mrf.mxu0 }
 0x316   :  { %v1034_v45 = vpop.f32.mrf.mxu0 }
 0x317   :  { %v1035_v46 = vadd.f32 %v1034_v45, %v1033_v44 }
 0x319   :  { %758 = vperm.xlu0 %1043, %v1035_v46  }
 0x33d   :  { %v765_v48 = vpop.permute.xlu1 %764 }
 0x341   :  { %v771_v51 = vpop.permute.xlu1 %770 }
 0x394   :  { %v759_v49 = vpop.permute.xlu0 %758 }
 0x395   :  { %v761_v50 = vsel %vm755_vm3, %v759_v49, 0.0 }
 0x396   :  { %v767_v52 = vsel %vm754_vm4, %v765_v48, %v761_v50 }
 0x397   :  { %v773_v53 = vsel %vm753_vm5, %v771_v51, %v767_v52 }
 0x398   :  { %774 = vst [vmem:[#allocation7] sm:$0x3] %v773_v53 }
 0x399   :  { %1114 = shalt.err (!%p1111_p0)
}
 0x39a   :  { %784 = dma.vmem_to_hbm [thread:$0]  %s782_s1, 32, %s1455_s2, [#allocation4]  }
 0x39b   :  { %1127 = dma.done.wait [#allocation4], 32  }
 0x39c   :  { %1128 = vsyncadd [#allocation4], 4294967264 }
 0x39d   :  { %788 = vsyncpa [#allocation3], 1 }
 0x39e   :  { %789 = vsyncpa [#allocation6], 1 }
 0x39f   :  { %790 = vsyncpa [#allocation4], 1 }

</bundles_post_ra>
